<compile_context>
chip_gen: v6e
topology: v6e:2x2x1
jax: 0.10.0
libtpu: 0.0.40
codegen_flags: <defaults>
</compile_context>

<pallas_src>
import functools
import math

import jax
import jax.numpy as jnp
from jax.experimental import pallas as pl
from jax.experimental.pallas import tpu as pltpu


def _round_up(x: int, m: int) -> int:
    return (x + m - 1) // m * m


def _nbeats_fc_kernel(num_layers, x_ref, *refs):
    """Fused (Linear + ReLU) x num_layers on one batch tile.

    refs = (w0, b0, w1, b1, ..., w_{L-1}, b_{L-1}, out_ref)
    x_ref : (TILE_N, D_in_pad)      VMEM
    w_l   : (D_l_pad, D_{l+1}_pad)  VMEM, resident across grid steps
    b_l   : (1, D_{l+1}_pad)        VMEM, resident across grid steps
    out   : (TILE_N, D_out_pad)     VMEM
    """
    out_ref = refs[-1]
    wb_refs = refs[:-1]

    h = x_ref[...].astype(jnp.float32)
    for layer in range(num_layers):
        w = wb_refs[2 * layer][...]
        b = wb_refs[2 * layer + 1][...]
        # MXU matmul with f32 accumulation; bias broadcast along sublanes.
        h = jnp.dot(h, w, preferred_element_type=jnp.float32) + b
        h = jnp.maximum(h, 0.0)  # ReLU in f32 (v5e has no bf16 VPU)
    out_ref[...] = h.astype(out_ref.dtype)


def nbeats_block_forward(x, weights, biases, *, tile_n=256, interpret=False):
    """Pallas forward of NBEATSBlock.fc.

    x        : [..., backcast_length]
    weights  : list of (in_dim, out_dim) float32 arrays (note: already
               transposed relative to torch's nn.Linear.weight)
    biases   : list of (out_dim,) float32 arrays
    returns  : [..., units]
    """
    num_layers = len(weights)
    assert len(biases) == num_layers

    lead_shape = x.shape[:-1]
    d_in = x.shape[-1]
    x2 = x.reshape(-1, d_in).astype(jnp.float32)
    n = x2.shape[0]

    # --- pad feature dims to lane multiples (128) ------------------------
    dims = [d_in] + [int(w.shape[1]) for w in weights]
    dims_pad = [_round_up(d, 128) for d in dims]
    d_out = dims[-1]
    d_out_pad = dims_pad[-1]

    x_pad_cols = dims_pad[0]

    # --- pad / tile batch dim --------------------------------------------
    if n >= tile_n:
        block_n = tile_n
        n_pad = _round_up(n, tile_n)
    else:
        block_n = _round_up(max(n, 1), 8)
        n_pad = block_n

    x_p = jnp.zeros((n_pad, x_pad_cols), jnp.float32)
    x_p = x_p.at[:n, :d_in].set(x2)

    # --- pad weights / biases (zero padding keeps math exact) ------------
    packed = []
    in_specs = [pl.BlockSpec((block_n, x_pad_cols), lambda i: (i, 0))]
    for layer in range(num_layers):
        w = weights[layer].astype(jnp.float32)
        b = biases[layer].astype(jnp.float32)
        in_p, out_p = dims_pad[layer], dims_pad[layer + 1]
        w_p = jnp.zeros((in_p, out_p), jnp.float32)
        w_p = w_p.at[: w.shape[0], : w.shape[1]].set(w)
        b_p = jnp.zeros((1, out_p), jnp.float32)
        b_p = b_p.at[0, : b.shape[0]].set(b)
        packed.extend([w_p, b_p])
        # Weights / biases are resident: constant block index across the grid.
        in_specs.append(pl.BlockSpec((in_p, out_p), lambda i: (0, 0)))
        in_specs.append(pl.BlockSpec((1, out_p), lambda i: (0, 0)))

    grid = (n_pad // block_n,)

    kernel = functools.partial(_nbeats_fc_kernel, num_layers)

    out_p = pl.pallas_call(
        kernel,
        out_shape=jax.ShapeDtypeStruct((n_pad, d_out_pad), jnp.float32),
        grid_spec=pltpu.PrefetchScalarGridSpec(
            num_scalar_prefetch=0,
            grid=grid,
            in_specs=in_specs,
            out_specs=pl.BlockSpec((block_n, d_out_pad), lambda i: (i, 0)),
        ),
        compiler_params=pltpu.CompilerParams(
            dimension_semantics=("parallel",),
        ),
        interpret=interpret,
    )(x_p, *packed)

    out = out_p[:n, :d_out]
    return out.reshape(lead_shape + (d_out,))


def nbeats_block_ref(x, weights, biases):
    """Pure-JAX reference (same math as the PyTorch fc stack)."""
    lead_shape = x.shape[:-1]
    h = x.reshape(-1, x.shape[-1]).astype(jnp.float32)
    for w, b in zip(weights, biases):
        h = jnp.maximum(jnp.dot(h, w) + b, 0.0)
    return h.reshape(lead_shape + (weights[-1].shape[1],))


if __name__ == "__main__":
    # Small shapes consistent with NBEATSBlock defaults:
    # backcast_length=10, units=32, num_block_layers=4, batch = (2, 8).
    backcast_length = 10
    units = 32
    num_block_layers = 4
    batch_shape = (2, 8)

    key = jax.random.PRNGKey(0)
    keys = jax.random.split(key, 2 * num_block_layers + 1)

    x = jax.random.normal(keys[0], batch_shape + (backcast_length,), jnp.float32)

    weights, biases = [], []
    in_dim = backcast_length
    for layer in range(num_block_layers):
        out_dim = units
        w = 0.1 * jax.random.normal(keys[1 + 2 * layer], (in_dim, out_dim), jnp.float32)
        b = 0.1 * jax.random.normal(keys[2 + 2 * layer], (out_dim,), jnp.float32)
        weights.append(w)
        biases.append(b)
        in_dim = out_dim

    out = nbeats_block_forward(x, weights, biases)
    out = jax.block_until_ready(out)

    ref = jax.block_until_ready(nbeats_block_ref(x, weights, biases))

    assert out.shape == batch_shape + (units,), out.shape
    assert jnp.allclose(out, ref, rtol=1e-3, atol=1e-3), (
        "mismatch: max abs err = %e" % float(jnp.max(jnp.abs(out - ref)))
    )

    # TODO(synk): theta_b_fc / theta_f_fc projections exist on the module but
    # are not used in forward(); they are intentionally not implemented here.

    print("KERNEL_OK")
</pallas_src>

<mosaic_0001>
module attributes {stable_mosaic.version = 11 : i64} {
  func.func @_nbeats_fc_kernel(%arg0: i32, %arg1: memref<16x128xf32, #tpu.memory_space<vmem>>, %arg2: memref<128x128xf32, #tpu.memory_space<vmem>>, %arg3: memref<1x128xf32, #tpu.memory_space<vmem>>, %arg4: memref<128x128xf32, #tpu.memory_space<vmem>>, %arg5: memref<1x128xf32, #tpu.memory_space<vmem>>, %arg6: memref<128x128xf32, #tpu.memory_space<vmem>>, %arg7: memref<1x128xf32, #tpu.memory_space<vmem>>, %arg8: memref<128x128xf32, #tpu.memory_space<vmem>>, %arg9: memref<1x128xf32, #tpu.memory_space<vmem>>, %arg10: memref<16x128xf32, #tpu.memory_space<vmem>>) attributes {dimension_semantics = [#tpu.dimension_semantics<parallel>], iteration_bounds = array<i64: 1>, scalar_prefetch = 0 : i64, scratch_operands = 0 : i64, tpu.core_type = #tpu.core_type<tc>, window_params = [{transform_indices = @transform_0, window_bounds = array<i64: 16, 128>}, {pipeline_mode = #tpu.pipeline_mode<synchronous>, transform_indices = @transform_1, window_bounds = array<i64: 128, 128>}, {pipeline_mode = #tpu.pipeline_mode<synchronous>, transform_indices = @transform_2, window_bounds = array<i64: 1, 128>}, {pipeline_mode = #tpu.pipeline_mode<synchronous>, transform_indices = @transform_3, window_bounds = array<i64: 128, 128>}, {pipeline_mode = #tpu.pipeline_mode<synchronous>, transform_indices = @transform_4, window_bounds = array<i64: 1, 128>}, {pipeline_mode = #tpu.pipeline_mode<synchronous>, transform_indices = @transform_5, window_bounds = array<i64: 128, 128>}, {pipeline_mode = #tpu.pipeline_mode<synchronous>, transform_indices = @transform_6, window_bounds = array<i64: 1, 128>}, {pipeline_mode = #tpu.pipeline_mode<synchronous>, transform_indices = @transform_7, window_bounds = array<i64: 128, 128>}, {pipeline_mode = #tpu.pipeline_mode<synchronous>, transform_indices = @transform_8, window_bounds = array<i64: 1, 128>}, {transform_indices = @transform_9, window_bounds = array<i64: 16, 128>}]} {
    %c0 = arith.constant 0 : index
    %c0_0 = arith.constant 0 : index
    %0 = vector.load %arg1[%c0, %c0_0] : memref<16x128xf32, #tpu.memory_space<vmem>>, vector<16x128xf32>
    %c0_1 = arith.constant 0 : index
    %c0_2 = arith.constant 0 : index
    %1 = vector.load %arg2[%c0_1, %c0_2] : memref<128x128xf32, #tpu.memory_space<vmem>>, vector<128x128xf32>
    %c0_3 = arith.constant 0 : index
    %c0_4 = arith.constant 0 : index
    %2 = vector.load %arg3[%c0_3, %c0_4] : memref<1x128xf32, #tpu.memory_space<vmem>>, vector<1x128xf32>
    %cst = arith.constant dense<0.000000e+00> : vector<16x128xf32>
    %3 = tpu.matmul %0, %1, %cst {dimension_numbers = #tpu.dot_dimension_numbers<[1], [0], [0], [1], [0, 0, 1, 1], [], []>} : vector<16x128xf32>, vector<128x128xf32>, vector<16x128xf32> -> vector<16x128xf32>
    %4 = vector.broadcast %2 : vector<1x128xf32> to vector<16x128xf32>
    %5 = arith.addf %3, %4 : vector<16x128xf32>
    %cst_5 = arith.constant 0.000000e+00 : f32
    %6 = vector.broadcast %cst_5 : f32 to vector<16x128xf32>
    %7 = arith.maximumf %5, %6 : vector<16x128xf32>
    %c0_6 = arith.constant 0 : index
    %c0_7 = arith.constant 0 : index
    %8 = vector.load %arg4[%c0_6, %c0_7] : memref<128x128xf32, #tpu.memory_space<vmem>>, vector<128x128xf32>
    %c0_8 = arith.constant 0 : index
    %c0_9 = arith.constant 0 : index
    %9 = vector.load %arg5[%c0_8, %c0_9] : memref<1x128xf32, #tpu.memory_space<vmem>>, vector<1x128xf32>
    %cst_10 = arith.constant dense<0.000000e+00> : vector<16x128xf32>
    %10 = tpu.matmul %7, %8, %cst_10 {dimension_numbers = #tpu.dot_dimension_numbers<[1], [0], [0], [1], [0, 0, 1, 1], [], []>} : vector<16x128xf32>, vector<128x128xf32>, vector<16x128xf32> -> vector<16x128xf32>
    %11 = vector.broadcast %9 : vector<1x128xf32> to vector<16x128xf32>
    %12 = arith.addf %10, %11 : vector<16x128xf32>
    %cst_11 = arith.constant 0.000000e+00 : f32
    %13 = vector.broadcast %cst_11 : f32 to vector<16x128xf32>
    %14 = arith.maximumf %12, %13 : vector<16x128xf32>
    %c0_12 = arith.constant 0 : index
    %c0_13 = arith.constant 0 : index
    %15 = vector.load %arg6[%c0_12, %c0_13] : memref<128x128xf32, #tpu.memory_space<vmem>>, vector<128x128xf32>
    %c0_14 = arith.constant 0 : index
    %c0_15 = arith.constant 0 : index
    %16 = vector.load %arg7[%c0_14, %c0_15] : memref<1x128xf32, #tpu.memory_space<vmem>>, vector<1x128xf32>
    %cst_16 = arith.constant dense<0.000000e+00> : vector<16x128xf32>
    %17 = tpu.matmul %14, %15, %cst_16 {dimension_numbers = #tpu.dot_dimension_numbers<[1], [0], [0], [1], [0, 0, 1, 1], [], []>} : vector<16x128xf32>, vector<128x128xf32>, vector<16x128xf32> -> vector<16x128xf32>
    %18 = vector.broadcast %16 : vector<1x128xf32> to vector<16x128xf32>
    %19 = arith.addf %17, %18 : vector<16x128xf32>
    %cst_17 = arith.constant 0.000000e+00 : f32
    %20 = vector.broadcast %cst_17 : f32 to vector<16x128xf32>
    %21 = arith.maximumf %19, %20 : vector<16x128xf32>
    %c0_18 = arith.constant 0 : index
    %c0_19 = arith.constant 0 : index
    %22 = vector.load %arg8[%c0_18, %c0_19] : memref<128x128xf32, #tpu.memory_space<vmem>>, vector<128x128xf32>
    %c0_20 = arith.constant 0 : index
    %c0_21 = arith.constant 0 : index
    %23 = vector.load %arg9[%c0_20, %c0_21] : memref<1x128xf32, #tpu.memory_space<vmem>>, vector<1x128xf32>
    %cst_22 = arith.constant dense<0.000000e+00> : vector<16x128xf32>
    %24 = tpu.matmul %21, %22, %cst_22 {dimension_numbers = #tpu.dot_dimension_numbers<[1], [0], [0], [1], [0, 0, 1, 1], [], []>} : vector<16x128xf32>, vector<128x128xf32>, vector<16x128xf32> -> vector<16x128xf32>
    %25 = vector.broadcast %23 : vector<1x128xf32> to vector<16x128xf32>
    %26 = arith.addf %24, %25 : vector<16x128xf32>
    %cst_23 = arith.constant 0.000000e+00 : f32
    %27 = vector.broadcast %cst_23 : f32 to vector<16x128xf32>
    %28 = arith.maximumf %26, %27 : vector<16x128xf32>
    %c0_24 = arith.constant 0 : index
    %c0_25 = arith.constant 0 : index
    %29 = vector.load %arg10[%c0_24, %c0_25] : memref<16x128xf32, #tpu.memory_space<vmem>>, vector<16x128xf32>
    tpu.vector_store %arg10[%c0_24, %c0_25], %28 {strides = array<i32>} : memref<16x128xf32, #tpu.memory_space<vmem>>, vector<16x128xf32>,
    return
  }
  func.func @transform_0(%arg0: i32) -> (i32, i32) {
    %c0_i32 = arith.constant 0 : i32
    %c0_i32_0 = arith.constant 0 : i32
    return %arg0, %c0_i32 : i32, i32
  }
  func.func @transform_1(%arg0: i32) -> (i32, i32) {
    %c0_i32 = arith.constant 0 : i32
    %c0_i32_0 = arith.constant 0 : i32
    %c0_i32_1 = arith.constant 0 : i32
    return %c0_i32, %c0_i32_0 : i32, i32
  }
  func.func @transform_2(%arg0: i32) -> (i32, i32) {
    %c0_i32 = arith.constant 0 : i32
    %c0_i32_0 = arith.constant 0 : i32
    %c0_i32_1 = arith.constant 0 : i32
    return %c0_i32, %c0_i32_0 : i32, i32
  }
  func.func @transform_3(%arg0: i32) -> (i32, i32) {
    %c0_i32 = arith.constant 0 : i32
    %c0_i32_0 = arith.constant 0 : i32
    %c0_i32_1 = arith.constant 0 : i32
    return %c0_i32, %c0_i32_0 : i32, i32
  }
  func.func @transform_4(%arg0: i32) -> (i32, i32) {
    %c0_i32 = arith.constant 0 : i32
    %c0_i32_0 = arith.constant 0 : i32
    %c0_i32_1 = arith.constant 0 : i32
    return %c0_i32, %c0_i32_0 : i32, i32
  }
  func.func @transform_5(%arg0: i32) -> (i32, i32) {
    %c0_i32 = arith.constant 0 : i32
    %c0_i32_0 = arith.constant 0 : i32
    %c0_i32_1 = arith.constant 0 : i32
    return %c0_i32, %c0_i32_0 : i32, i32
  }
  func.func @transform_6(%arg0: i32) -> (i32, i32) {
    %c0_i32 = arith.constant 0 : i32
    %c0_i32_0 = arith.constant 0 : i32
    %c0_i32_1 = arith.constant 0 : i32
    return %c0_i32, %c0_i32_0 : i32, i32
  }
  func.func @transform_7(%arg0: i32) -> (i32, i32) {
    %c0_i32 = arith.constant 0 : i32
    %c0_i32_0 = arith.constant 0 : i32
    %c0_i32_1 = arith.constant 0 : i32
    return %c0_i32, %c0_i32_0 : i32, i32
  }
  func.func @transform_8(%arg0: i32) -> (i32, i32) {
    %c0_i32 = arith.constant 0 : i32
    %c0_i32_0 = arith.constant 0 : i32
    %c0_i32_1 = arith.constant 0 : i32
    return %c0_i32, %c0_i32_0 : i32, i32
  }
  func.func @transform_9(%arg0: i32) -> (i32, i32) {
    %c0_i32 = arith.constant 0 : i32
    %c0_i32_0 = arith.constant 0 : i32
    return %arg0, %c0_i32 : i32, i32
  }
}

</mosaic_0001>

<bundles_post_ra>
// kernel: tpu_custom_call.1
= control target key start
LH: loop header
LB: loop body
LE: loop exit
PB: predicated region body
PF: predicated region fallthrough
CT: control target
= control target key end

     0   :  { %14 = vsyncpa [#allocation3], 0  ;;  %s982_s0 = inlined_call_operand.hbm [shape: f32[16,128], index: 0, kind: input, shape index: {}]   ;;  %s983_s1 = inlined_call_operand.hbm [shape: f32[128,128], index: 1, kind: input, shape index: {}]   ;;  %s984_s2 = inlined_call_operand.vmem [shape: f32[1,128], index: 2, kind: input, shape index: {}]   ;;  %s985_s3 = inlined_call_operand.hbm [shape: f32[128,128], index: 3, kind: input, shape index: {}]   ;;  %s986_s4 = inlined_call_operand.vmem [shape: f32[1,128], index: 4, kind: input, shape index: {}]   ;;  %s987_s5 = inlined_call_operand.hbm [shape: f32[128,128], index: 5, kind: input, shape index: {}]   ;;  %s988_s6 = inlined_call_operand.vmem [shape: f32[1,128], index: 6, kind: input, shape index: {}]   ;;  %s989_s7 = inlined_call_operand.hbm [shape: f32[128,128], index: 7, kind: input, shape index: {}]   ;;  %s990_s8 = inlined_call_operand.vmem [shape: f32[1,128], index: 8, kind: input, shape index: {}]   ;;  %s991_s9 = inlined_call_operand.hbm [shape: f32[16,128], index: 9, kind: output, shape index: {}]  }
   0x1   :  { %15 = vsyncpa [#allocation6], 0 }
   0x2   :  { %16 = vsyncpa [#allocation9], 0 }
   0x3   :  { %17 = vsyncpa [#allocation4], 0  ;;  %s876_s30 = smov [#allocation5]   ;;  %s877_s11 = smov [#allocation8]  }
   0x4   :  { %s35_s10 = sshll.u32 %s876_s30, 4  ;;  %s63_s12 = sshll.u32 %s877_s11, 4  ;;  %s36_s10 = int_to_ptr.vmem [resolvable:$true] %s35_s10  ;;  %s64_s12 = int_to_ptr.vmem [resolvable:$true] %s63_s12 }
   0x5   :  { %s756_s13 = scalar_lea.vmem %s36_s10, 2048  ;;  %p761_p1 = scmp.lt.s32.totalorder %s36_s10, %s36_s10 }
   0x6   :  { %p757_p0 = scmp.ne.s32.totalorder %s36_s10, %s756_s13  ;;  %p762_p2 = scmp.lt.s32.totalorder %s756_s13, %s756_s13 }
   0x8   :  { %p763_p3 = por %p762_p2, %p761_p1 }
   0xa   :  { %p764_p4 = pnand %p763_p3, %p757_p0 }
   0xc   :  { %767 = shalt.err (!%p764_p4)
}
   0xd   :  { %s878_s14 = smov 128   ;;  %s879_s15 = smov 8  }
   0xe   :  { %41 = dma.hbm_to_vmem [thread:$0]  %s983_s1, 2048, %s36_s10, [#allocation6], %s878_s14, %s878_s14, %s879_s15  }
   0xf   :  { %s776_s18 = scalar_lea.vmem %s64_s12, 2048  ;;  %p781_p6 = scmp.lt.s32.totalorder %s64_s12, %s64_s12 }
  0x10   :  { %p777_p5 = scmp.ne.s32.totalorder %s64_s12, %s776_s18  ;;  %p782_p7 = scmp.lt.s32.totalorder %s776_s18, %s776_s18 }
  0x12   :  { %p783_p8 = por %p782_p7, %p781_p6 }
  0x14   :  { %p784_p9 = pnand %p783_p8, %p777_p5 }
  0x16   :  { %787 = shalt.err (!%p784_p9)
}
  0x17   :  { %69 = dma.hbm_to_vmem [thread:$0]  %s987_s5, 2048, %s64_s12, [#allocation9], %s878_s14, %s878_s14, %s879_s15  }
  0x18   :  { %s880_s21 = smov [#allocation2]   ;;  %s881_s23 = smov [#allocation7]  }
  0x19   :  { %s23_s22 = sshll.u32 %s880_s21, 4  ;;  %s49_s24 = sshll.u32 %s881_s23, 4  ;;  %s24_s22 = int_to_ptr.vmem [resolvable:$true] %s23_s22  ;;  %s50_s24 = int_to_ptr.vmem [resolvable:$true] %s49_s24 }
  0x1a   :  { %s796_s1 = scalar_lea.vmem %s24_s22, 256  ;;  %p801_p11 = scmp.lt.s32.totalorder %s24_s22, %s24_s22 }
  0x1b   :  { %p797_p10 = scmp.ne.s32.totalorder %s24_s22, %s796_s1  ;;  %p802_p12 = scmp.lt.s32.totalorder %s796_s1, %s796_s1 }
  0x1d   :  { %p803_p13 = por %p802_p12, %p801_p11 }
  0x1f   :  { %p804_p0 = pnand %p803_p13, %p797_p10 }
  0x21   :  { %807 = shalt.err (!%p804_p0)
}
  0x22   :  { %29 = dma.hbm_to_vmem [thread:$0]  %s982_s0, 256, %s24_s22, [#allocation3], %s878_s14, %s878_s14, %s879_s15  }
  0x23   :  { %s816_s5 = scalar_lea.vmem %s50_s24, 2048  ;;  %p821_p2 = scmp.lt.s32.totalorder %s50_s24, %s50_s24 }
  0x24   :  { %p817_p1 = scmp.ne.s32.totalorder %s50_s24, %s816_s5  ;;  %p822_p3 = scmp.lt.s32.totalorder %s816_s5, %s816_s5 }
  0x26   :  { %p823_p4 = por %p822_p3, %p821_p2 }
  0x28   :  { %p824_p5 = pnand %p823_p4, %p817_p1 }
  0x2a   :  { %827 = shalt.err (!%p824_p5)
}
  0x2b   :  { %55 = dma.hbm_to_vmem [thread:$0]  %s985_s3, 2048, %s50_s24, [#allocation6], %s878_s14, %s878_s14, %s879_s15  }
  0x2c   :  { %s882_s29 = smov [#allocation10]  }
  0x2d   :  { %s77_s30 = sshll.u32 %s882_s29, 4  ;;  %s78_s30 = int_to_ptr.vmem [resolvable:$true] %s77_s30 }
  0x2e   :  { %s836_s10 = scalar_lea.vmem %s78_s30, 2048  ;;  %p841_p7 = scmp.lt.s32.totalorder %s78_s30, %s78_s30 }
  0x2f   :  { %p837_p6 = scmp.ne.s32.totalorder %s78_s30, %s836_s10  ;;  %p842_p8 = scmp.lt.s32.totalorder %s836_s10, %s836_s10 }
  0x31   :  { %p843_p9 = por %p842_p8, %p841_p7 }
  0x33   :  { %p844_p10 = pnand %p843_p9, %p837_p6 }
  0x35   :  { %847 = shalt.err (!%p844_p10)
}
  0x36   :  { %83 = dma.hbm_to_vmem [thread:$0]  %s989_s7, 2048, %s78_s30, [#allocation9], %s878_s14, %s878_s14, %s879_s15  }
  0x37   :  { %868 = dma.done.wait [#allocation3], 256  }
  0x38   :  { %869 = vsyncadd [#allocation3], 4294967040 }
  0x39   :  { %870 = dma.done.wait [#allocation6], 4096  }
  0x3a   :  { %871 = vsyncadd [#allocation6], 4294963200 }
  0x3b   :  { %872 = dma.done.wait [#allocation9], 4096  }
  0x3c   :  { %873 = vsyncadd [#allocation9], 4294963200  ;;  %v118_v0 = vld [vmem:[#allocation5 + $0x78] sm:$0xff]  ;;  %v117_v1 = vld [vmem:[#allocation5 + $0x70] sm:$0xff]  ;;  %s883_s18 = smov [#allocation11]  }
  0x3d   :  { %600 = vmatprep.subr.mxu0 %v118_v0  ;;  %v116_v2 = vld [vmem:[#allocation5 + $0x68] sm:$0xff]  ;;  %v115_v3 = vld [vmem:[#allocation5 + $0x60] sm:$0xff]  ;;  %v101_v4 = vld [vmem:[#allocation2] sm:$0xff]  ;;  %s510_s19 = sshll.u32 %s883_s18, 4  ;;  %s511_s19 = int_to_ptr.vmem [resolvable:$true] %s510_s19 }
  0x3e   :  { %601 = vmatpush3.msra.mxu0 %v118_v0  ;;  %v114_v5 = vld [vmem:[#allocation5 + $0x58] sm:$0xff]  ;;  %632 = vmatprep.mubr.f32.mxu0 %v101_v4  ;;  %v217_v7 = vld [vmem:[#allocation7 + $0x70] sm:$0xff]  ;;  %v216_v9 = vld [vmem:[#allocation7 + $0x68] sm:$0xff]  ;;  %p853_p12 = scmp.lt.s32.totalorder %s511_s19, %s511_s19 }
  0x3f   :  { %602 = vmatprep.subr.mxu0 %v117_v1  ;;  %v218_v6 = vld [vmem:[#allocation7 + $0x78] sm:$0xff]  ;;  %v113_v8 = vld [vmem:[#allocation5 + $0x50] sm:$0xff]  ;;  %v112_v10 = vld [vmem:[#allocation5 + $0x48] sm:$0xff] }
  0x40   :  { %603 = vmatpush3.msra.mxu0 %v117_v1  ;;  %635 = vmatprep.subr.mxu1 %v218_v6  ;;  %v215_v11 = vld [vmem:[#allocation7 + $0x60] sm:$0xff]  ;;  %v214_v13 = vld [vmem:[#allocation7 + $0x58] sm:$0xff]  ;;  %v213_v15 = vld [vmem:[#allocation7 + $0x50] sm:$0xff] }
  0x41   :  { %604 = vmatprep.subr.mxu0 %v116_v2  ;;  %636 = vmatpush3.msra.mxu1 %v218_v6  ;;  %v111_v12 = vld [vmem:[#allocation5 + $0x40] sm:$0xff]  ;;  %v110_v14 = vld [vmem:[#allocation5 + $0x38] sm:$0xff]  ;;  %v109_v16 = vld [vmem:[#allocation5 + $0x30] sm:$0xff] }
  0x42   :  { %605 = vmatpush3.msra.mxu0 %v116_v2  ;;  %637 = vmatprep.subr.mxu1 %v217_v7  ;;  %v212_v17 = vld [vmem:[#allocation7 + $0x48] sm:$0xff]  ;;  %v211_v19 = vld [vmem:[#allocation7 + $0x40] sm:$0xff]  ;;  %v210_v21 = vld [vmem:[#allocation7 + $0x38] sm:$0xff] }
  0x43   :  { %606 = vmatprep.subr.mxu0 %v115_v3  ;;  %638 = vmatpush3.msra.mxu1 %v217_v7  ;;  %v108_v18 = vld [vmem:[#allocation5 + $0x28] sm:$0xff]  ;;  %v107_v20 = vld [vmem:[#allocation5 + $0x20] sm:$0xff]  ;;  %v106_v22 = vld [vmem:[#allocation5 + $0x18] sm:$0xff] }
  0x44   :  { %607 = vmatpush3.msra.mxu0 %v115_v3  ;;  %639 = vmatprep.subr.mxu1 %v216_v9  ;;  %v209_v23 = vld [vmem:[#allocation7 + $0x30] sm:$0xff]  ;;  %v208_v25 = vld [vmem:[#allocation7 + $0x28] sm:$0xff]  ;;  %v207_v27 = vld [vmem:[#allocation7 + $0x20] sm:$0xff] }
  0x45   :  { %608 = vmatprep.subr.mxu0 %v114_v5  ;;  %640 = vmatpush3.msra.mxu1 %v216_v9  ;;  %v105_v24 = vld [vmem:[#allocation5 + $0x10] sm:$0xff]  ;;  %v104_v26 = vld [vmem:[#allocation5 + $0x8] sm:$0xff]  ;;  %v103_v28 = vld [vmem:[#allocation5] sm:$0xff] }
  0x46   :  { %609 = vmatpush3.msra.mxu0 %v114_v5  ;;  %641 = vmatprep.subr.mxu1 %v215_v11  ;;  %v102_v29 = vld [vmem:[#allocation2 + $0x8] sm:$0xff]  ;;  %v205_v31 = vld [vmem:[#allocation7 + $0x10] sm:$0xff]  ;;  %v204_v32 = vld [vmem:[#allocation7 + $0x8] sm:$0xff] }
  0x47   :  { %610 = vmatprep.subr.mxu0 %v113_v8  ;;  %642 = vmatpush3.msra.mxu1 %v215_v11  ;;  %v206_v30 = vld [vmem:[#allocation7 + $0x18] sm:$0xff]  ;;  %v203_v33 = vld [vmem:[#allocation7] sm:$0xff]  ;;  %v317_v35 = vld [vmem:[#allocation8 + $0x70] sm:$0xff] }
  0x48   :  { %611 = vmatpush3.msra.mxu0 %v113_v8  ;;  %643 = vmatprep.subr.mxu1 %v214_v13  ;;  %v318_v34 = vld [vmem:[#allocation8 + $0x78] sm:$0xff]  ;;  %v316_v36 = vld [vmem:[#allocation8 + $0x68] sm:$0xff]  ;;  %v315_v37 = vld [vmem:[#allocation8 + $0x60] sm:$0xff] }
  0x49   :  { %612 = vmatprep.subr.mxu0 %v112_v10  ;;  %644 = vmatpush3.msra.mxu1 %v214_v13  ;;  %v314_v38 = vld [vmem:[#allocation8 + $0x58] sm:$0xff]  ;;  %v313_v39 = vld [vmem:[#allocation8 + $0x50] sm:$0xff]  ;;  %v312_v40 = vld [vmem:[#allocation8 + $0x48] sm:$0xff] }
  0x4a   :  { %613 = vmatpush3.msra.mxu0 %v112_v10  ;;  %645 = vmatprep.subr.mxu1 %v213_v15  ;;  %v311_v41 = vld [vmem:[#allocation8 + $0x40] sm:$0xff]  ;;  %v310_v42 = vld [vmem:[#allocation8 + $0x38] sm:$0xff]  ;;  %v309_v43 = vld [vmem:[#allocation8 + $0x30] sm:$0xff] }
  0x4b   :  { %614 = vmatprep.subr.mxu0 %v111_v12  ;;  %646 = vmatpush3.msra.mxu1 %v213_v15  ;;  %v308_v44 = vld [vmem:[#allocation8 + $0x28] sm:$0xff]  ;;  %v307_v45 = vld [vmem:[#allocation8 + $0x20] sm:$0xff]  ;;  %v524_v46 = vld [vmem:[%s984_s2] ss:$0 sm:$0xff] }
  0x4c   :  { %615 = vmatpush3.msra.mxu0 %v111_v12  ;;  %647 = vmatprep.subr.mxu1 %v212_v17  ;;  %v306_v53 = vld [vmem:[#allocation8 + $0x18] sm:$0xff]  ;;  %v305_v54 = vld [vmem:[#allocation8 + $0x10] sm:$0xff]  ;;  %v304_v55 = vld [vmem:[#allocation8 + $0x8] sm:$0xff] }
  0x4d   :  { %616 = vmatprep.subr.mxu0 %v110_v14  ;;  %648 = vmatpush3.msra.mxu1 %v212_v17  ;;  %v303_v56 = vld [vmem:[#allocation8] sm:$0xff]  ;;  %v418_v57 = vld [vmem:[#allocation10 + $0x78] sm:$0xff]  ;;  %v417_v58 = vld [vmem:[#allocation10 + $0x70] sm:$0xff] }
  0x4e   :  { %617 = vmatpush3.msra.mxu0 %v110_v14  ;;  %649 = vmatprep.subr.mxu1 %v211_v19  ;;  %v416_v59 = vld [vmem:[#allocation10 + $0x68] sm:$0xff]  ;;  %v415_v60 = vld [vmem:[#allocation10 + $0x60] sm:$0xff]  ;;  %v414_v61 = vld [vmem:[#allocation10 + $0x58] sm:$0xff] }
  0x4f   :  { %618 = vmatprep.subr.mxu0 %v109_v16  ;;  %650 = vmatpush3.msra.mxu1 %v211_v19  ;;  %v413_v62 = vld [vmem:[#allocation10 + $0x50] sm:$0xff]  ;;  %v412_v63 = vld [vmem:[#allocation10 + $0x48] sm:$0xff]  ;;  %v411_v0 = vld [vmem:[#allocation10 + $0x40] sm:$0xff] }
  0x50   :  { %619 = vmatpush3.msra.mxu0 %v109_v16  ;;  %651 = vmatprep.subr.mxu1 %v210_v21  ;;  %v410_v1 = vld [vmem:[#allocation10 + $0x38] sm:$0xff]  ;;  %v409_v2 = vld [vmem:[#allocation10 + $0x30] sm:$0xff]  ;;  %v408_v3 = vld [vmem:[#allocation10 + $0x28] sm:$0xff] }
  0x51   :  { %620 = vmatprep.subr.mxu0 %v108_v18  ;;  %652 = vmatpush3.msra.mxu1 %v210_v21  ;;  %v407_v4 = vld [vmem:[#allocation10 + $0x20] sm:$0xff]  ;;  %v525_v5 = vld [vmem:[%s986_s4] ss:$0 sm:$0xff]  ;;  %v406_v12 = vld [vmem:[#allocation10 + $0x18] sm:$0xff] }
  0x52   :  { %621 = vmatpush3.msra.mxu0 %v108_v18  ;;  %653 = vmatprep.subr.mxu1 %v209_v23  ;;  %v405_v13 = vld [vmem:[#allocation10 + $0x10] sm:$0xff]  ;;  %v404_v14 = vld [vmem:[#allocation10 + $0x8] sm:$0xff]  ;;  %v403_v15 = vld [vmem:[#allocation10] sm:$0xff] }
  0x53   :  { %622 = vmatprep.subr.mxu0 %v107_v20  ;;  %654 = vmatpush3.msra.mxu1 %v209_v23  ;;  %v526_v16 = vld [vmem:[%s988_s6] ss:$0 sm:$0xff]  ;;  %s848_s6 = scalar_lea.vmem %s511_s19, 256 }
  0x54   :  { %623 = vmatpush3.msra.mxu0 %v107_v20  ;;  %655 = vmatprep.subr.mxu1 %v208_v25  ;;  %v527_v23 = vld [vmem:[%s990_s8] ss:$0 sm:$0xff]  ;;  %p849_p11 = scmp.ne.s32.totalorder %s511_s19, %s848_s6  ;;  %p854_p13 = scmp.lt.s32.totalorder %s848_s6, %s848_s6 }
  0x55   :  { %624 = vmatprep.subr.mxu0 %v106_v22  ;;  %656 = vmatpush3.msra.mxu1 %v208_v25 }
  0x56   :  { %625 = vmatpush3.msra.mxu0 %v106_v22  ;;  %657 = vmatprep.subr.mxu1 %v207_v27  ;;  %p855_p0 = por %p854_p13, %p853_p12 }
  0x57   :  { %626 = vmatprep.subr.mxu0 %v105_v24  ;;  %658 = vmatpush3.msra.mxu1 %v207_v27 }
  0x58   :  { %627 = vmatpush3.msra.mxu0 %v105_v24  ;;  %659 = vmatprep.subr.mxu1 %v206_v30  ;;  %p856_p1 = pnand %p855_p0, %p849_p11 }
  0x59   :  { %628 = vmatprep.subr.mxu0 %v104_v26  ;;  %660 = vmatpush3.msra.mxu1 %v206_v30 }
  0x5a   :  { %629 = vmatpush3.msra.mxu0 %v104_v26  ;;  %661 = vmatprep.subr.mxu1 %v205_v31 }
  0x5b   :  { %630 = vmatprep.subr.mxu0 %v103_v28  ;;  %662 = vmatpush3.msra.mxu1 %v205_v31 }
  0x5c   :  { %631 = vmatpush3.msra.mxu0 %v103_v28  ;;  %663 = vmatprep.subr.mxu1 %v204_v32 }
  0x5d   :  { %633 = vmatmul.mubr.f32.vlgmr.msra.gmra.mxu0 %v102_v29  ;;  %664 = vmatpush3.msra.mxu1 %v204_v32 }
  0x5e   :  { %665 = vmatprep.subr.mxu1 %v203_v33  ;;  %670 = vmatprep.subr.mxu0 %v318_v34 }
  0x5f   :  { %666 = vmatpush3.msra.mxu1 %v203_v33  ;;  %671 = vmatpush3.msra.mxu0 %v318_v34 }
  0x60   :  { %672 = vmatprep.subr.mxu0 %v317_v35  ;;  %705 = vmatprep.subr.mxu1 %v418_v57 }
  0x61   :  { %673 = vmatpush3.msra.mxu0 %v317_v35 }
  0x62   :  { %674 = vmatprep.subr.mxu0 %v316_v36 }
  0x63   :  { %675 = vmatpush3.msra.mxu0 %v316_v36 }
  0x64   :  { %676 = vmatprep.subr.mxu0 %v315_v37 }
  0x65   :  { %677 = vmatpush3.msra.mxu0 %v315_v37 }
  0x66   :  { %678 = vmatprep.subr.mxu0 %v314_v38 }
  0x67   :  { %679 = vmatpush3.msra.mxu0 %v314_v38 }
  0x68   :  { %680 = vmatprep.subr.mxu0 %v313_v39 }
  0x69   :  { %681 = vmatpush3.msra.mxu0 %v313_v39 }
  0x6a   :  { %682 = vmatprep.subr.mxu0 %v312_v40 }
  0x6b   :  { %683 = vmatpush3.msra.mxu0 %v312_v40 }
  0x6c   :  { %684 = vmatprep.subr.mxu0 %v311_v41 }
  0x6d   :  { %685 = vmatpush3.msra.mxu0 %v311_v41 }
  0x6e   :  { %686 = vmatprep.subr.mxu0 %v310_v42 }
  0x6f   :  { %687 = vmatpush3.msra.mxu0 %v310_v42 }
  0x70   :  { %688 = vmatprep.subr.mxu0 %v309_v43 }
  0x71   :  { %689 = vmatpush3.msra.mxu0 %v309_v43 }
  0x72   :  { %690 = vmatprep.subr.mxu0 %v308_v44 }
  0x73   :  { %691 = vmatpush3.msra.mxu0 %v308_v44 }
  0x74   :  { %692 = vmatprep.subr.mxu0 %v307_v45 }
  0x75   :  { %693 = vmatpush3.msra.mxu0 %v307_v45 }
  0x76   :  { %694 = vmatprep.subr.mxu0 %v306_v53 }
  0x77   :  { %695 = vmatpush3.msra.mxu0 %v306_v53 }
  0x78   :  { %696 = vmatprep.subr.mxu0 %v305_v54 }
  0x79   :  { %697 = vmatpush3.msra.mxu0 %v305_v54 }
  0x7a   :  { %698 = vmatprep.subr.mxu0 %v304_v55 }
  0x7b   :  { %699 = vmatpush3.msra.mxu0 %v304_v55 }
  0x7c   :  { %700 = vmatprep.subr.mxu0 %v303_v56 }
  0x7d   :  { %701 = vmatpush3.msra.mxu0 %v303_v56 }
 0x11d   :  { %v634_v47 = vpop.f32.mrf.mxu0 }
 0x11e   :  { %v198_v48 = vadd.f32 %v634_v47, %v524_v46 }
 0x11f   :  { %v192_v49 = vpop.f32.mrf.mxu0 }
 0x120   :  { %v193_v50 = vadd.f32 %v524_v46, %v192_v49  ;;  %v202_v52 = vmax.f32 %v198_v48, 0.0 }
 0x122   :  { %v201_v51 = vmax.f32 %v193_v50, 0.0 }
 0x124   :  { %667 = vmatprep.mubr.f32.mxu1 %v201_v51 }
 0x125   :  { %668 = vmatmul.mubr.f32.vlgmr.msra.gmra.mxu1 %v202_v52 }
 0x126   :  { %706 = vmatpush3.msra.mxu1 %v418_v57 }
 0x127   :  { %707 = vmatprep.subr.mxu1 %v417_v58 }
 0x128   :  { %708 = vmatpush3.msra.mxu1 %v417_v58 }
 0x129   :  { %709 = vmatprep.subr.mxu1 %v416_v59 }
 0x12a   :  { %710 = vmatpush3.msra.mxu1 %v416_v59 }
 0x12b   :  { %711 = vmatprep.subr.mxu1 %v415_v60 }
 0x12c   :  { %712 = vmatpush3.msra.mxu1 %v415_v60 }
 0x12d   :  { %713 = vmatprep.subr.mxu1 %v414_v61 }
 0x12e   :  { %714 = vmatpush3.msra.mxu1 %v414_v61 }
 0x12f   :  { %715 = vmatprep.subr.mxu1 %v413_v62 }
 0x130   :  { %716 = vmatpush3.msra.mxu1 %v413_v62 }
 0x131   :  { %717 = vmatprep.subr.mxu1 %v412_v63 }
 0x132   :  { %718 = vmatpush3.msra.mxu1 %v412_v63 }
 0x133   :  { %719 = vmatprep.subr.mxu1 %v411_v0 }
 0x134   :  { %720 = vmatpush3.msra.mxu1 %v411_v0 }
 0x135   :  { %721 = vmatprep.subr.mxu1 %v410_v1 }
 0x136   :  { %722 = vmatpush3.msra.mxu1 %v410_v1 }
 0x137   :  { %723 = vmatprep.subr.mxu1 %v409_v2 }
 0x138   :  { %724 = vmatpush3.msra.mxu1 %v409_v2 }
 0x139   :  { %725 = vmatprep.subr.mxu1 %v408_v3 }
 0x13a   :  { %726 = vmatpush3.msra.mxu1 %v408_v3 }
 0x13b   :  { %727 = vmatprep.subr.mxu1 %v407_v4 }
 0x13c   :  { %728 = vmatpush3.msra.mxu1 %v407_v4 }
 0x13d   :  { %729 = vmatprep.subr.mxu1 %v406_v12 }
 0x13e   :  { %730 = vmatpush3.msra.mxu1 %v406_v12 }
 0x13f   :  { %731 = vmatprep.subr.mxu1 %v405_v13 }
 0x140   :  { %732 = vmatpush3.msra.mxu1 %v405_v13 }
 0x141   :  { %733 = vmatprep.subr.mxu1 %v404_v14 }
 0x142   :  { %734 = vmatpush3.msra.mxu1 %v404_v14 }
 0x143   :  { %735 = vmatprep.subr.mxu1 %v403_v15 }
 0x144   :  { %736 = vmatpush3.msra.mxu1 %v403_v15 }
 0x1e5   :  { %v669_v6 = vpop.f32.mrf.mxu1 }
 0x1e6   :  { %v298_v7 = vadd.f32 %v669_v6, %v525_v5 }
 0x1e7   :  { %v292_v8 = vpop.f32.mrf.mxu1 }
 0x1e8   :  { %v293_v9 = vadd.f32 %v525_v5, %v292_v8  ;;  %v302_v11 = vmax.f32 %v298_v7, 0.0 }
 0x1ea   :  { %v301_v10 = vmax.f32 %v293_v9, 0.0 }
 0x1ec   :  { %702 = vmatprep.mubr.f32.mxu0 %v301_v10 }
 0x1ed   :  { %703 = vmatmul.mubr.f32.vlgmr.msra.gmra.mxu0 %v302_v11 }
 0x2ad   :  { %v704_v17 = vpop.f32.mrf.mxu0 }
 0x2ae   :  { %v398_v18 = vadd.f32 %v704_v17, %v526_v16 }
 0x2af   :  { %v392_v19 = vpop.f32.mrf.mxu0 }
 0x2b0   :  { %v393_v20 = vadd.f32 %v526_v16, %v392_v19  ;;  %v402_v22 = vmax.f32 %v398_v18, 0.0 }
 0x2b2   :  { %v401_v21 = vmax.f32 %v393_v20, 0.0 }
 0x2b4   :  { %737 = vmatprep.mubr.f32.mxu1 %v401_v21 }
 0x2b5   :  { %738 = vmatmul.mubr.f32.vlgmr.msra.gmra.mxu1 %v402_v22 }
 0x375   :  { %v739_v24 = vpop.f32.mrf.mxu1 }
 0x376   :  { %v498_v25 = vadd.f32 %v739_v24, %v527_v23 }
 0x377   :  { %v492_v26 = vpop.f32.mrf.mxu1 }
 0x378   :  { %v502_v27 = vmax.f32 %v498_v25, 0.0  ;;  %v493_v28 = vadd.f32 %v527_v23, %v492_v26 }
 0x37a   :  { %504 = vst [vmem:[#allocation11 + $0x8] sm:$0xff] %v502_v27  ;;  %v501_v29 = vmax.f32 %v493_v28, 0.0 }
 0x37c   :  { %503 = vst [vmem:[#allocation11] sm:$0xff] %v501_v29 }
 0x37d   :  { %859 = shalt.err (!%p856_p1)
}
 0x37e   :  { %516 = dma.vmem_to_hbm [thread:$0]  %s511_s19, 256, %s991_s9, [#allocation4], %s878_s14, %s878_s14, %s879_s15  }
 0x37f   :  { %874 = dma.done.wait [#allocation4], 256  }
 0x380   :  { %875 = vsyncadd [#allocation4], 4294967040 }
 0x381   :  { %520 = vsyncpa [#allocation3], 1 }
 0x382   :  { %521 = vsyncpa [#allocation6], 1 }
 0x383   :  { %522 = vsyncpa [#allocation9], 1 }
 0x384   :  { %523 = vsyncpa [#allocation4], 1 }

</bundles_post_ra>
